<compile_context>
chip_gen: v6e
topology: v6e:2x2x1
jax: 0.10.0
libtpu: 0.0.40
codegen_flags: <defaults>
</compile_context>

<pallas_src>
import math

import jax
import jax.numpy as jnp
from jax import lax
from jax.experimental import pallas as pl
from jax.experimental.pallas import tpu as pltpu

_INV_SQRT2 = 1.0 / math.sqrt(2.0)


# --------------------------------------------------------------------------------------
# Kernels
# --------------------------------------------------------------------------------------
def _gelu(h, approximate):
    if approximate:
        # tanh runs on the EUP (separate VLIW slot) -- opt-in, deviates slightly from
        # PyTorch's exact GELU.
        return jax.nn.gelu(h, approximate=True)
    # exact GELU (PyTorch nn.GELU default): 0.5 * x * (1 + erf(x / sqrt(2)))
    return 0.5 * h * (1.0 + lax.erf(h * _INV_SQRT2))


def _make_resident_kernel(approximate_gelu):
    # Weights fully VMEM-resident (constant block index); one fused step per token tile.
    def kernel(x_ref, w1_ref, b1_ref, w2_ref, b2_ref, o_ref):
        h = jnp.dot(x_ref[...], w1_ref[...], preferred_element_type=jnp.float32)
        h = _gelu(h + b1_ref[...], approximate_gelu)
        # dropout with p=0.0 is the identity -> nothing to do.
        o_ref[...] = (
            jnp.dot(h.astype(w2_ref.dtype), w2_ref[...],
                    preferred_element_type=jnp.float32)
            + b2_ref[...]
        ).astype(o_ref.dtype)

    return kernel


def _make_streamed_kernel(approximate_gelu):
    # Hidden dim tiled as a reduction grid axis; f32 accumulator resident across it.
    def kernel(x_ref, w1_ref, b1_ref, w2_ref, b2_ref, o_ref, acc_ref):
        h_idx = pl.program_id(1)

        h = jnp.dot(x_ref[...], w1_ref[...], preferred_element_type=jnp.float32)
        h = _gelu(h + b1_ref[...], approximate_gelu)
        part = jnp.dot(h.astype(w2_ref.dtype), w2_ref[...],
                       preferred_element_type=jnp.float32)

        @pl.when(h_idx == 0)
        def _():
            # Assign first partial (+ b2 folded in) instead of zero-init + add.
            acc_ref[...] = part + b2_ref[...]

        @pl.when(h_idx > 0)
        def _():
            acc_ref[...] += part

        @pl.when(h_idx == pl.num_programs(1) - 1)
        def _():
            o_ref[...] = acc_ref[...].astype(o_ref.dtype)

    return kernel


# --------------------------------------------------------------------------------------
# Helpers
# --------------------------------------------------------------------------------------
def _round_up(a, b):
    return (a + b - 1) // b * b


def _cdiv(a, b):
    return (a + b - 1) // b


def _pad2(a, rows, cols, dtype):
    """Zero-pad a 2-D array to (rows, cols) and cast; no-op if already matching."""
    r, c = a.shape
    if (r, c) == (rows, cols) and a.dtype == jnp.dtype(dtype):
        return a
    return jnp.zeros((rows, cols), dtype).at[:r, :c].set(a.astype(dtype))


def _vmem_capacity_bytes():
    try:
        info = pltpu.get_tpu_info()
        cap = getattr(info, "vmem_capacity_bytes", None)
        if cap:
            return int(cap)
    except Exception:
        pass
    return 64 * 1024 * 1024  # conservative default (v7x per-TensorCore)


def _choose_tm(M, tm_target):
    """Row tile: minimize padding waste; >=2 blocks when M is big enough (v7x megacore)."""
    tm_target = max(16, _round_up(tm_target, 16))
    n_blk = max(1, _cdiv(M, tm_target))
    if n_blk == 1 and M >= 256:
        n_blk = 2  # give both v7x TensorCores a token tile
    tm = max(16, _round_up(_cdiv(M, n_blk), 16))
    return min(tm, _round_up(M, 16))


def _th_candidates(Hp):
    """128-multiples that exactly divide Hp, largest first."""
    units = Hp // 128
    return sorted({d * 128 for d in range(1, units + 1) if units % d == 0}, reverse=True)


def _resident_bytes(tm, Cp, Hp, Cop, cd_size, out_size):
    weights = 2 * (Cp * Hp * cd_size + Hp * Cop * cd_size + Hp * 4 + Cop * 4)
    tiles = 2 * tm * Cp * cd_size + 2 * tm * Cop * out_size
    temp = tm * Hp * 4  # f32 GELU intermediate
    return weights + tiles + temp


def _streamed_bytes(tm, th, Cp, Cop, cd_size, out_size):
    weights = 2 * (Cp * th * cd_size + th * Cop * cd_size + th * 4 + Cop * 4)
    tiles = 2 * tm * Cp * cd_size + 2 * tm * Cop * out_size
    acc = tm * Cop * 4
    temp = tm * th * 4
    return weights + tiles + acc + temp


# --------------------------------------------------------------------------------------
# Public API
# --------------------------------------------------------------------------------------
def prepare_mlp_params(w1, b1, w2, b2, *, compute_dtype=jnp.bfloat16):
    """Pad features to 128 multiples and cast weights once (cache across calls).

    w1: (C, H), b1: (H,), w2: (H, Co), b2: (Co,)  -- weights stored (in, out),
    i.e. the transpose of PyTorch nn.Linear's (out, in) layout.
    """
    C, H = w1.shape
    Co = w2.shape[1]
    Cp, Hp, Cop = _round_up(C, 128), _round_up(H, 128), _round_up(Co, 128)
    return dict(
        C=C, H=H, Co=Co, Cp=Cp, Hp=Hp, Cop=Cop, compute_dtype=compute_dtype,
        w1=_pad2(w1, Cp, Hp, compute_dtype),
        b1=_pad2(b1.reshape(1, -1), 1, Hp, jnp.float32),
        w2=_pad2(w2, Hp, Cop, compute_dtype),
        b2=_pad2(b2.reshape(1, -1), 1, Cop, jnp.float32),
    )


def mlp_pallas_prepared(x, params, *, tm=512, th=512,
                        approximate_gelu=False, force_path=None):
    C, Co = params["C"], params["Co"]
    Cp, Hp, Cop = params["Cp"], params["Hp"], params["Cop"]
    cd = params["compute_dtype"]
    w1_p, b1_p, w2_p, b2_p = params["w1"], params["b1"], params["w2"], params["b2"]

    orig_shape = x.shape
    assert orig_shape[-1] == C, "last dim of x must equal in_features"
    out_dtype = x.dtype

    x2 = x.reshape(-1, C)
    M = x2.shape[0]

    tm_eff = _choose_tm(M, tm)
    Mp = _round_up(M, tm_eff)
    x_p = _pad2(x2, Mp, Cp, cd)  # zero padding is exact for Linear/GELU/Linear

    cd_size = jnp.dtype(cd).itemsize
    out_size = jnp.dtype(out_dtype).itemsize

    vmem_cap = _vmem_capacity_bytes()
    budget = int(vmem_cap * 0.7)

    est_res = _resident_bytes(tm_eff, Cp, Hp, Cop, cd_size, out_size)
    use_resident = est_res <= budget
    if force_path == "resident":
        use_resident = True
    elif force_path == "streamed":
        use_resident = False

    if use_resident:
        est = est_res
        kernel = _make_resident_kernel(approximate_gelu)
        grid_spec = pltpu.PrefetchScalarGridSpec(
            num_scalar_prefetch=0,
            grid=(Mp // tm_eff,),
            in_specs=[
                pl.BlockSpec((tm_eff, Cp), lambda i: (i, 0)),   # x token tile
                pl.BlockSpec((Cp, Hp), lambda i: (0, 0)),       # w1, resident
                pl.BlockSpec((1, Hp), lambda i: (0, 0)),        # b1, resident
                pl.BlockSpec((Hp, Cop), lambda i: (0, 0)),      # w2, resident
                pl.BlockSpec((1, Cop), lambda i: (0, 0)),       # b2, resident
            ],
            out_specs=pl.BlockSpec((tm_eff, Cop), lambda i: (i, 0)),
        )
        dim_sem = ("parallel",)
    else:
        th_target = max(128, _round_up(th, 128))
        th_eff = 128
        for cand in _th_candidates(Hp):
            if cand <= th_target and _streamed_bytes(
                    tm_eff, cand, Cp, Cop, cd_size, out_size) <= budget:
                th_eff = cand
                break
        est = _streamed_bytes(tm_eff, th_eff, Cp, Cop, cd_size, out_size)
        kernel = _make_streamed_kernel(approximate_gelu)
        grid_spec = pltpu.PrefetchScalarGridSpec(
            num_scalar_prefetch=0,
            grid=(Mp // tm_eff, Hp // th_eff),
            in_specs=[
                pl.BlockSpec((tm_eff, Cp), lambda i, h: (i, 0)),   # x token tile
                pl.BlockSpec((Cp, th_eff), lambda i, h: (0, h)),   # w1 hidden slice
                pl.BlockSpec((1, th_eff), lambda i, h: (0, h)),    # b1 hidden slice
                pl.BlockSpec((th_eff, Cop), lambda i, h: (h, 0)),  # w2 hidden slice
                pl.BlockSpec((1, Cop), lambda i, h: (0, 0)),       # b2
            ],
            out_specs=pl.BlockSpec((tm_eff, Cop), lambda i, h: (i, 0)),
            scratch_shapes=[pltpu.VMEM((tm_eff, Cop), jnp.float32)],
        )
        dim_sem = ("parallel", "arbitrary")

    # Right-size the scoped-VMEM request; never ask for the whole physical VMEM (v7x).
    vmem_limit = max(32 * 1024 * 1024, int(est * 1.3) + (4 << 20))
    vmem_limit = min(vmem_limit, int(vmem_cap * 0.75))

    out = pl.pallas_call(
        kernel,
        out_shape=jax.ShapeDtypeStruct((Mp, Cop), out_dtype),
        grid_spec=grid_spec,
        compiler_params=pltpu.CompilerParams(
            dimension_semantics=dim_sem,
            vmem_limit_bytes=vmem_limit,
        ),
    )(x_p, w1_p, b1_p, w2_p, b2_p)

    if (Mp, Cop) != (M, Co):
        out = out[:M, :Co]
    return out.reshape(orig_shape[:-1] + (Co,))


def mlp_pallas(x, w1, b1, w2, b2, *, tm=512, th=512,
               compute_dtype=jnp.bfloat16, approximate_gelu=False,
               force_path=None):
    """Fused fc1 -> GELU -> fc2 (dropout p=0 is identity). x: (..., C)."""
    params = prepare_mlp_params(w1, b1, w2, b2, compute_dtype=compute_dtype)
    return mlp_pallas_prepared(x, params, tm=tm, th=th,
                               approximate_gelu=approximate_gelu,
                               force_path=force_path)


def mlp_reference(x, w1, b1, w2, b2):
    h = jnp.dot(x, w1) + b1
    h = jax.nn.gelu(h, approximate=False)
    return jnp.dot(h, w2) + b2


# --------------------------------------------------------------------------------------
# Self-test
# --------------------------------------------------------------------------------------
if __name__ == "__main__":
    # Module config (small): in_features=32, hidden_features=64, out_features=32
    in_features, hidden_features, out_features = 32, 64, 32
    batch, seq = 2, 8  # 16 token rows total

    key = jax.random.PRNGKey(0)
    kx, kw1, kb1, kw2, kb2 = jax.random.split(key, 5)

    x = jax.random.normal(kx, (batch, seq, in_features), dtype=jnp.float32)
    w1 = jax.random.normal(kw1, (in_features, hidden_features), jnp.float32) * 0.02
    b1 = jax.random.normal(kb1, (hidden_features,), jnp.float32) * 0.02
    w2 = jax.random.normal(kw2, (hidden_features, out_features), jnp.float32) * 0.02
    b2 = jax.random.normal(kb2, (out_features,), jnp.float32) * 0.02

    # Resident-weight fast path (default at these sizes).
    y = jax.block_until_ready(mlp_pallas(x, w1, b1, w2, b2))
    y_ref = mlp_reference(x, w1, b1, w2, b2)
    assert y.shape == (batch, seq, out_features)
    # bf16 MXU feeds with f32 accumulation -> relaxed tolerance vs f32 reference.
    assert jnp.allclose(y, y_ref, atol=2e-2, rtol=2e-2), "resident path mismatch"

    # Also exercise the streamed (hidden-axis reduction) fallback with a multi-step
    # hidden reduction, as used when production-size weights exceed the VMEM budget.
    h2 = 256
    w1b = jax.random.normal(kw1, (in_features, h2), jnp.float32) * 0.02
    b1b = jax.random.normal(kb1, (h2,), jnp.float32) * 0.02
    w2b = jax.random.normal(kw2, (h2, out_features), jnp.float32) * 0.02
    y_s = jax.block_until_ready(
        mlp_pallas(x, w1b, b1b, w2b, b2, th=128, force_path="streamed"))
    y_s_ref = mlp_reference(x, w1b, b1b, w2b, b2)
    assert jnp.allclose(y_s, y_s_ref, atol=2e-2, rtol=2e-2), "streamed path mismatch"

    print("KERNEL_OK")
</pallas_src>

<mosaic_0001>
module attributes {stable_mosaic.version = 11 : i64} {
  func.func @kernel(%arg0: i32, %arg1: memref<16x128xbf16, #tpu.memory_space<vmem>>, %arg2: memref<128x128xbf16, #tpu.memory_space<vmem>>, %arg3: memref<1x128xf32, #tpu.memory_space<vmem>>, %arg4: memref<128x128xbf16, #tpu.memory_space<vmem>>, %arg5: memref<1x128xf32, #tpu.memory_space<vmem>>, %arg6: memref<16x128xf32, #tpu.memory_space<vmem>>) attributes {dimension_semantics = [#tpu.dimension_semantics<parallel>], iteration_bounds = array<i64: 1>, scalar_prefetch = 0 : i64, scratch_operands = 0 : i64, tpu.core_type = #tpu.core_type<tc>, window_params = [{transform_indices = @transform_0, window_bounds = array<i64: 16, 128>}, {pipeline_mode = #tpu.pipeline_mode<synchronous>, transform_indices = @transform_1, window_bounds = array<i64: 128, 128>}, {pipeline_mode = #tpu.pipeline_mode<synchronous>, transform_indices = @transform_2, window_bounds = array<i64: 1, 128>}, {pipeline_mode = #tpu.pipeline_mode<synchronous>, transform_indices = @transform_3, window_bounds = array<i64: 128, 128>}, {pipeline_mode = #tpu.pipeline_mode<synchronous>, transform_indices = @transform_4, window_bounds = array<i64: 1, 128>}, {transform_indices = @transform_5, window_bounds = array<i64: 16, 128>}]} {
    %c0 = arith.constant 0 : index
    %c0_0 = arith.constant 0 : index
    %0 = vector.load %arg1[%c0, %c0_0] : memref<16x128xbf16, #tpu.memory_space<vmem>>, vector<16x128xbf16>
    %c0_1 = arith.constant 0 : index
    %c0_2 = arith.constant 0 : index
    %1 = vector.load %arg2[%c0_1, %c0_2] : memref<128x128xbf16, #tpu.memory_space<vmem>>, vector<128x128xbf16>
    %cst = arith.constant dense<0.000000e+00> : vector<16x128xf32>
    %2 = tpu.matmul %0, %1, %cst {dimension_numbers = #tpu.dot_dimension_numbers<[1], [0], [0], [1], [0, 0, 1, 1], [], []>} : vector<16x128xbf16>, vector<128x128xbf16>, vector<16x128xf32> -> vector<16x128xf32>
    %c0_3 = arith.constant 0 : index
    %c0_4 = arith.constant 0 : index
    %3 = vector.load %arg3[%c0_3, %c0_4] : memref<1x128xf32, #tpu.memory_space<vmem>>, vector<1x128xf32>
    %4 = vector.broadcast %3 : vector<1x128xf32> to vector<16x128xf32>
    %5 = arith.addf %2, %4 : vector<16x128xf32>
    %cst_5 = arith.constant 5.000000e-01 : f32
    %6 = vector.broadcast %cst_5 : f32 to vector<16x128xf32>
    %7 = arith.mulf %6, %5 : vector<16x128xf32>
    %cst_6 = arith.constant 0.707106769 : f32
    %8 = vector.broadcast %cst_6 : f32 to vector<16x128xf32>
    %9 = arith.mulf %5, %8 : vector<16x128xf32>
    %10 = math.erf %9 : vector<16x128xf32>
    %cst_7 = arith.constant 1.000000e+00 : f32
    %11 = vector.broadcast %cst_7 : f32 to vector<16x128xf32>
    %12 = arith.addf %11, %10 : vector<16x128xf32>
    %13 = arith.mulf %7, %12 : vector<16x128xf32>
    %14 = arith.truncf %13 : vector<16x128xf32> to vector<16x128xbf16>
    %c0_8 = arith.constant 0 : index
    %c0_9 = arith.constant 0 : index
    %15 = vector.load %arg4[%c0_8, %c0_9] : memref<128x128xbf16, #tpu.memory_space<vmem>>, vector<128x128xbf16>
    %cst_10 = arith.constant dense<0.000000e+00> : vector<16x128xf32>
    %16 = tpu.matmul %14, %15, %cst_10 {dimension_numbers = #tpu.dot_dimension_numbers<[1], [0], [0], [1], [0, 0, 1, 1], [], []>} : vector<16x128xbf16>, vector<128x128xbf16>, vector<16x128xf32> -> vector<16x128xf32>
    %c0_11 = arith.constant 0 : index
    %c0_12 = arith.constant 0 : index
    %17 = vector.load %arg5[%c0_11, %c0_12] : memref<1x128xf32, #tpu.memory_space<vmem>>, vector<1x128xf32>
    %18 = vector.broadcast %17 : vector<1x128xf32> to vector<16x128xf32>
    %19 = arith.addf %16, %18 : vector<16x128xf32>
    %c0_13 = arith.constant 0 : index
    %c0_14 = arith.constant 0 : index
    %20 = vector.load %arg6[%c0_13, %c0_14] : memref<16x128xf32, #tpu.memory_space<vmem>>, vector<16x128xf32>
    tpu.vector_store %arg6[%c0_13, %c0_14], %19 {strides = array<i32>} : memref<16x128xf32, #tpu.memory_space<vmem>>, vector<16x128xf32>,
    return
  }
  func.func @transform_0(%arg0: i32) -> (i32, i32) {
    %c0_i32 = arith.constant 0 : i32
    %c0_i32_0 = arith.constant 0 : i32
    return %arg0, %c0_i32 : i32, i32
  }
  func.func @transform_1(%arg0: i32) -> (i32, i32) {
    %c0_i32 = arith.constant 0 : i32
    %c0_i32_0 = arith.constant 0 : i32
    %c0_i32_1 = arith.constant 0 : i32
    return %c0_i32, %c0_i32_0 : i32, i32
  }
  func.func @transform_2(%arg0: i32) -> (i32, i32) {
    %c0_i32 = arith.constant 0 : i32
    %c0_i32_0 = arith.constant 0 : i32
    %c0_i32_1 = arith.constant 0 : i32
    return %c0_i32, %c0_i32_0 : i32, i32
  }
  func.func @transform_3(%arg0: i32) -> (i32, i32) {
    %c0_i32 = arith.constant 0 : i32
    %c0_i32_0 = arith.constant 0 : i32
    %c0_i32_1 = arith.constant 0 : i32
    return %c0_i32, %c0_i32_0 : i32, i32
  }
  func.func @transform_4(%arg0: i32) -> (i32, i32) {
    %c0_i32 = arith.constant 0 : i32
    %c0_i32_0 = arith.constant 0 : i32
    %c0_i32_1 = arith.constant 0 : i32
    return %c0_i32, %c0_i32_0 : i32, i32
  }
  func.func @transform_5(%arg0: i32) -> (i32, i32) {
    %c0_i32 = arith.constant 0 : i32
    %c0_i32_0 = arith.constant 0 : i32
    return %arg0, %c0_i32 : i32, i32
  }
}

</mosaic_0001>

<bundles_post_ra>
// kernel: tpu_custom_call.1
= control target key start
LH: loop header
LB: loop body
LE: loop exit
PB: predicated region body
PF: predicated region fallthrough
CT: control target
= control target key end

     0   :  { %10 = vsyncpa [#allocation3], 0  ;;  %s578_s0 = inlined_call_operand.hbm [shape: bf16[16,128], index: 0, kind: input, shape index: {}]   ;;  %s579_s1 = inlined_call_operand.hbm [shape: bf16[128,128], index: 1, kind: input, shape index: {}]   ;;  %s580_s2 = inlined_call_operand.vmem [shape: f32[1,128], index: 2, kind: input, shape index: {}]   ;;  %s581_s3 = inlined_call_operand.hbm [shape: bf16[128,128], index: 3, kind: input, shape index: {}]   ;;  %s582_s4 = inlined_call_operand.vmem [shape: f32[1,128], index: 4, kind: input, shape index: {}]   ;;  %s583_s5 = inlined_call_operand.hbm [shape: f32[16,128], index: 5, kind: output, shape index: {}]  }
   0x1   :  { %11 = vsyncpa [#allocation6], 0 }
   0x2   :  { %12 = vsyncpa [#allocation4], 0  ;;  %s520_s18 = smov [#allocation5]   ;;  %s521_s20 = smov [#allocation2]  }
   0x3   :  { %s30_s19 = sshll.u32 %s520_s18, 4  ;;  %s18_s21 = sshll.u32 %s521_s20, 4  ;;  %s31_s19 = int_to_ptr.vmem [resolvable:$true] %s30_s19  ;;  %s19_s21 = int_to_ptr.vmem [resolvable:$true] %s18_s21 }
   0x4   :  { %s442_s22 = scalar_lea.vmem %s31_s19, 1024  ;;  %p447_p1 = scmp.lt.s32.totalorder %s31_s19, %s31_s19 }
   0x5   :  { %p443_p0 = scmp.ne.s32.totalorder %s31_s19, %s442_s22  ;;  %p448_p2 = scmp.lt.s32.totalorder %s442_s22, %s442_s22 }
   0x7   :  { %p449_p3 = por %p448_p2, %p447_p1 }
   0x9   :  { %p450_p4 = pnand %p449_p3, %p443_p0 }
   0xb   :  { %453 = shalt.err (!%p450_p4)
}
   0xc   :  { %s522_s23 = smov 64   ;;  %s523_s24 = smov 4  }
   0xd   :  { %36 = dma.hbm_to_vmem [thread:$0]  %s579_s1, 1024, %s31_s19, [#allocation6], %s522_s23, %s522_s23, %s523_s24  }
   0xe   :  { %s462_s27 = scalar_lea.vmem %s19_s21, 128  ;;  %p467_p6 = scmp.lt.s32.totalorder %s19_s21, %s19_s21 }
   0xf   :  { %p463_p5 = scmp.ne.s32.totalorder %s19_s21, %s462_s27  ;;  %p468_p7 = scmp.lt.s32.totalorder %s462_s27, %s462_s27 }
  0x11   :  { %p469_p8 = por %p468_p7, %p467_p6 }
  0x13   :  { %p470_p9 = pnand %p469_p8, %p463_p5 }
  0x15   :  { %473 = shalt.err (!%p470_p9)
}
  0x16   :  { %24 = dma.hbm_to_vmem [thread:$0]  %s578_s0, 128, %s19_s21, [#allocation3], %s522_s23, %s522_s23, %s523_s24  }
  0x17   :  { %s524_s30 = smov [#allocation7]  }
  0x18   :  { %s44_s6 = sshll.u32 %s524_s30, 4  ;;  %s45_s6 = int_to_ptr.vmem [resolvable:$true] %s44_s6 }
  0x19   :  { %s482_s7 = scalar_lea.vmem %s45_s6, 1024  ;;  %p487_p11 = scmp.lt.s32.totalorder %s45_s6, %s45_s6 }
  0x1a   :  { %p483_p10 = scmp.ne.s32.totalorder %s45_s6, %s482_s7  ;;  %p488_p12 = scmp.lt.s32.totalorder %s482_s7, %s482_s7 }
  0x1c   :  { %p489_p13 = por %p488_p12, %p487_p11 }
  0x1e   :  { %p490_p0 = pnand %p489_p13, %p483_p10 }
  0x20   :  { %493 = shalt.err (!%p490_p0)
}
  0x21   :  { %50 = dma.hbm_to_vmem [thread:$0]  %s581_s3, 1024, %s45_s6, [#allocation6], %s522_s23, %s522_s23, %s523_s24  }
  0x22   :  { %514 = dma.done.wait [#allocation3], 128  }
  0x23   :  { %515 = vsyncadd [#allocation3], 4294967168 }
  0x24   :  { %516 = dma.done.wait [#allocation6], 2048  }
  0x25   :  { %517 = vsyncadd [#allocation6], 4294965248  ;;  %v525_v0 = vmov 0.0   ;;  %vm526_vm0 = vmmov 0   ;;  %v413_v1 = vld [vmem:[#allocation5 + $0x38] sm:$0xff]   ;;  %v414_v2 = vld [vmem:[#allocation5 + $0x30] sm:$0xff]  }
  0x26   :  { %363 = vmatprep.subr.bf16.mxu0 %v525_v0  ;;  %379 = vmatprep.mubr.msk.bf16.mxu0 %vm526_vm0, %v525_v0  ;;  %v415_v3 = vld [vmem:[#allocation5 + $0x28] sm:$0xff]   ;;  %v422_v4 = vld [vmem:[#allocation7 + $0x38] sm:$0xff]   ;;  %v416_v5 = vld [vmem:[#allocation5 + $0x20] sm:$0xff]   ;;  %s527_s10 = smov [#allocation8]  }
  0x27   :  { %383 = vmatprep.subr.bf16.mxu1 %v525_v0  ;;  %399 = vmatprep.mubr.msk.bf16.mxu1 %vm526_vm0, %v525_v0  ;;  %v417_v6 = vld [vmem:[#allocation5 + $0x18] sm:$0xff]   ;;  %v418_v7 = vld [vmem:[#allocation5 + $0x10] sm:$0xff]   ;;  %v419_v8 = vld [vmem:[#allocation5 + $0x8] sm:$0xff]   ;;  %s313_s11 = sshll.u32 %s527_s10, 4  ;;  %s314_s11 = int_to_ptr.vmem [resolvable:$true] %s313_s11 }
  0x28   :  { %364 = vmatpush3.bf16.msra.mxu0 %v413_v1  ;;  %384 = vmatpush3.bf16.msra.mxu1 %v422_v4  ;;  %v420_v9 = vld [vmem:[#allocation5] sm:$0xff]   ;;  %v421_v10 = vld [vmem:[#allocation2] sm:$0xff]   ;;  %v423_v11 = vld [vmem:[#allocation7 + $0x30] sm:$0xff]   ;;  %s494_s12 = scalar_lea.vmem %s314_s11, 256  ;;  %p499_p2 = scmp.lt.s32.totalorder %s314_s11, %s314_s11 }
  0x29   :  { %365 = vmatprep.subr.bf16.mxu0 %v525_v0  ;;  %385 = vmatprep.subr.bf16.mxu1 %v525_v0  ;;  %v424_v12 = vld [vmem:[#allocation7 + $0x28] sm:$0xff]   ;;  %v425_v13 = vld [vmem:[#allocation7 + $0x20] sm:$0xff]   ;;  %v426_v14 = vld [vmem:[#allocation7 + $0x18] sm:$0xff]   ;;  %p495_p1 = scmp.ne.s32.totalorder %s314_s11, %s494_s12  ;;  %p500_p3 = scmp.lt.s32.totalorder %s494_s12, %s494_s12 }
  0x2a   :  { %v427_v15 = vld [vmem:[#allocation7 + $0x10] sm:$0xff]   ;;  %v428_v16 = vld [vmem:[#allocation7 + $0x8] sm:$0xff]   ;;  %v429_v17 = vld [vmem:[#allocation7] sm:$0xff]  }
  0x2b   :  { %v326_v18 = vld [vmem:[%s580_s2] ss:$0 sm:$0xff]  ;;  %p501_p4 = por %p500_p3, %p499_p2 }
  0x2c   :  { %366 = vmatpush3.bf16.msra.mxu0 %v414_v2  ;;  %386 = vmatpush3.bf16.msra.mxu1 %v423_v11  ;;  %v336_v36 = vld [vmem:[%s582_s4] ss:$0 sm:$0xff] }
  0x2d   :  { %367 = vmatprep.subr.bf16.mxu0 %v525_v0  ;;  %387 = vmatprep.subr.bf16.mxu1 %v525_v0  ;;  %p502_p5 = pnand %p501_p4, %p495_p1 }
  0x30   :  { %368 = vmatpush3.bf16.msra.mxu0 %v415_v3  ;;  %388 = vmatpush3.bf16.msra.mxu1 %v424_v12 }
  0x31   :  { %369 = vmatprep.subr.bf16.mxu0 %v525_v0  ;;  %389 = vmatprep.subr.bf16.mxu1 %v525_v0 }
  0x34   :  { %370 = vmatpush3.bf16.msra.mxu0 %v416_v5  ;;  %390 = vmatpush3.bf16.msra.mxu1 %v425_v13 }
  0x35   :  { %371 = vmatprep.subr.bf16.mxu0 %v525_v0  ;;  %391 = vmatprep.subr.bf16.mxu1 %v525_v0 }
  0x38   :  { %372 = vmatpush3.bf16.msra.mxu0 %v417_v6  ;;  %392 = vmatpush3.bf16.msra.mxu1 %v426_v14 }
  0x39   :  { %373 = vmatprep.subr.bf16.mxu0 %v525_v0  ;;  %393 = vmatprep.subr.bf16.mxu1 %v525_v0 }
  0x3c   :  { %374 = vmatpush3.bf16.msra.mxu0 %v418_v7  ;;  %394 = vmatpush3.bf16.msra.mxu1 %v427_v15 }
  0x3d   :  { %375 = vmatprep.subr.bf16.mxu0 %v525_v0  ;;  %395 = vmatprep.subr.bf16.mxu1 %v525_v0 }
  0x40   :  { %376 = vmatpush3.bf16.msra.mxu0 %v419_v8  ;;  %396 = vmatpush3.bf16.msra.mxu1 %v428_v16 }
  0x41   :  { %377 = vmatprep.subr.bf16.mxu0 %v525_v0  ;;  %397 = vmatprep.subr.bf16.mxu1 %v525_v0 }
  0x44   :  { %378 = vmatpush3.bf16.msra.mxu0 %v420_v9  ;;  %398 = vmatpush3.bf16.msra.mxu1 %v429_v17 }
  0x47   :  { %380 = vmatmul.mubr.bf16.vlgmr.msra.gmra.mxu0 %v421_v10 }
 0x107   :  { %v176_v19 = vpop.f32.mrf.mxu0 }
 0x108   :  { %v177_v20 = vadd.f32 %v326_v18, %v176_v19 }
 0x109   :  { %v381_v21 = vpop.f32.mrf.mxu0 }
 0x10a   :  { %v185_v22 = vmul.f32 0.70710677, %v177_v20  ;;  %v183_v30 = vmul.f32 0.5, %v177_v20 }
 0x10b   :  { %v179_v23 = vpop.f32.mrf.mxu0 }
 0x10c   :  { %430 = verf.f32 %v185_v22  ;;  %v180_v24 = vadd.f32 %v326_v18, %v179_v23 }
 0x10d   :  { %v382_v25 = vpop.f32.mrf.mxu0 }
 0x10e   :  { %v186_v26 = vmul.f32 0.70710677, %v180_v24  ;;  %v184_v31 = vmul.f32 0.5, %v180_v24 }
 0x110   :  { %432 = verf.f32 %v186_v26 }
 0x119   :  { %v431_v27 = vpop.eup %430 }
 0x11a   :  { %v189_v28 = vadd.f32 1.0, %v431_v27 }
 0x11c   :  { %v191_v33 = vmul.f32 %v189_v28, %v183_v30 }
 0x11d   :  { %v433_v29 = vpop.eup %432 }
 0x11e   :  { %v190_v32 = vadd.f32 1.0, %v433_v29 }
 0x120   :  { %v192_v34 = vmul.f32 %v190_v32, %v184_v31 }
 0x122   :  { %v193_v35 = vpack.c.bf16 %v192_v34, %v191_v33 }
 0x124   :  { %400 = vmatmul.mubr.bf16.vlgmr.msra.gmra.mxu1 %v193_v35 }
 0x1e4   :  { %v299_v37 = vpop.f32.mrf.mxu1 }
 0x1e5   :  { %v300_v38 = vadd.f32 %v336_v36, %v299_v37 }
 0x1e6   :  { %v401_v39 = vpop.f32.mrf.mxu1 }
 0x1e7   :  { %306 = vst [vmem:[#allocation8] sm:$0xff] %v300_v38 }
 0x1e8   :  { %v302_v40 = vpop.f32.mrf.mxu1 }
 0x1e9   :  { %v303_v41 = vadd.f32 %v336_v36, %v302_v40 }
 0x1ea   :  { %v402_v42 = vpop.f32.mrf.mxu1 }
 0x1eb   :  { %307 = vst [vmem:[#allocation8 + $0x8] sm:$0xff] %v303_v41 }
 0x1ec   :  { %505 = shalt.err (!%p502_p5)
}
 0x1ed   :  { %s528_s13 = smov 128   ;;  %s529_s4 = smov 8  }
 0x1ee   :  { %319 = dma.vmem_to_hbm [thread:$0]  %s314_s11, 256, %s583_s5, [#allocation4], %s528_s13, %s528_s13, %s529_s4  }
 0x1ef   :  { %518 = dma.done.wait [#allocation4], 256  }
 0x1f0   :  { %519 = vsyncadd [#allocation4], 4294967040 }
 0x1f1   :  { %323 = vsyncpa [#allocation3], 1 }
 0x1f2   :  { %324 = vsyncpa [#allocation6], 1 }
 0x1f3   :  { %325 = vsyncpa [#allocation4], 1 }

</bundles_post_ra>
